<compile_context>
chip_gen: v7x
topology: tpu7x:2x2x1
jax: 0.10.0
libtpu: 0.0.40
codegen_flags: <defaults>
</compile_context>

<pallas_src>
import functools

import numpy as np
import jax
import jax.numpy as jnp
from jax import lax
from jax.experimental import pallas as pl
from jax.experimental.pallas import tpu as pltpu


def _round_up(x: int, m: int) -> int:
    return ((x + m - 1) // m) * m


def _xor_flip_matrices(n_qubit: int) -> np.ndarray:
    """P[q] such that (s @ P[q])[i] == s[i ^ (1 << q)] (row-vector state)."""
    dim = 2 ** n_qubit
    idx = np.arange(dim)
    p = np.zeros((n_qubit, dim, dim), np.float32)
    for q in range(n_qubit):
        p[q, idx, idx ^ (1 << q)] = 1.0
    return p


def _cx_chain_matrix(n_qubit: int) -> np.ndarray:
    """Composed CX chain CX(0,1) CX(1,2) ... CX(nq-2,nq-1), applied as
    `state @ P_chain` (row-vector convention, matches the per-gate apply_cx)."""
    dim = 2 ** n_qubit
    chain = np.eye(dim, dtype=np.float32)
    for ctrl in range(n_qubit - 1):
        tgt = ctrl + 1
        m = np.zeros((dim, dim), np.float32)
        for i in range(dim):
            j = i ^ (1 << tgt) if (i >> ctrl) & 1 else i
            m[j, i] = 1.0            # (old @ m)[i] = old[j]
        chain = chain @ m
    return chain


def _make_qlayer_kernel(n_qubit: int, n_layer: int):
    dim = 2 ** n_qubit

    def kernel(cin_ref, sin_ref, cth_ref, sth_ref, pflip_ref, pchain_ref, out_ref):
        # cin/sin : (block_b, n_qubit)          cos/sin of encoding half-angles
        # cth/sth : (block_b, n_qubit*n_layer)  cos/sin of theta/2
        # pflip   : (n_qubit, dim, dim)         static per-qubit bit-flip perms
        # pchain  : (dim, dim)                  static composed CX-chain perm
        # out     : (block_b, 1)                P(|0...0>) per batch row

        # Per-qubit lane masks, hoisted once and reused across all layers.
        idx = lax.broadcasted_iota(jnp.int32, (1, dim), 1)
        b1 = [((idx >> q) & 1).astype(jnp.float32) for q in range(n_qubit)]
        b0 = [1.0 - b for b in b1]
        sgn = [b1[q] - b0[q] for q in range(n_qubit)]   # +1 where bit=1, -1 else

        cin = cin_ref[...]
        sin_ = sin_ref[...]
        cth = cth_ref[...]
        sth = sth_ref[...]

        # --- Encoding layer RY(2*x_q) acting on |0..0>, folded into a pure-VPU
        #     kron-column product: state[b, i] = prod_q (bit_q(i) ? sin x : cos x).
        state = cin[:, 0:1] * b0[0] + sin_[:, 0:1] * b1[0]
        for q in range(1, n_qubit):
            state = state * (cin[:, q:q + 1] * b0[q] + sin_[:, q:q + 1] * b1[q])

        # --- Variational layers 0 .. n_layer-2: per-qubit RY (one MXU matmul
        #     with the static flip permutation), then the whole CX chain as ONE
        #     static permutation matmul.
        for l in range(n_layer - 1):
            for q in range(n_qubit):
                k = l * n_qubit + q
                flipped = jnp.dot(state, pflip_ref[q],
                                  preferred_element_type=jnp.float32)
                state = cth[:, k:k + 1] * state + sgn[q] * (sth[:, k:k + 1] * flipped)
            state = jnp.dot(state, pchain_ref[...],
                            preferred_element_type=jnp.float32)

        # --- Last RY layer + final CX chain collapsed into one inner product:
        #     the final CX chain leaves the |0..0> amplitude untouched, and
        #     row 0 of the last RY layer's kron is prod_q (bit_q ? -sin : cos).
        kl = (n_layer - 1) * n_qubit
        w = cth[:, kl:kl + 1] * b0[0] - sth[:, kl:kl + 1] * b1[0]
        for q in range(1, n_qubit):
            k = kl + q
            w = w * (cth[:, k:k + 1] * b0[q] - sth[:, k:k + 1] * b1[q])
        amp0 = jnp.sum(w * state, axis=-1, keepdims=True)   # (block_b, 1)

        # Only RY / CX gates -> state is real; P(|0..0>) = amp0 ** 2.
        out_ref[...] = amp0 * amp0

    return kernel


@functools.partial(jax.jit, static_argnames=("n_qubit", "n_layer"))
def qlayer_forward_batched(inputs, thetas, n_qubit=4, n_layer=2):
    """Exact P(|0...0>) for a batch of (input, theta) parameter sets.

    inputs: (B, n_qubit)          encoding angles (circuit applies RY(2*input))
    thetas: (B, n_qubit*n_layer)  variational RY angles
    returns: (B, 1) float32 probabilities
    """
    assert n_layer >= 1
    if n_qubit > 8:
        # TODO(synk): for n_qubit > 8 the per-qubit (dim,dim) flip matrices get
        # too big for VMEM; switch to a 2-D (rows x 128k-lane) state layout.
        raise NotImplementedError("n_qubit > 8 requires the 2-D state layout")

    dim = 2 ** n_qubit
    B = inputs.shape[0]
    inputs = jnp.asarray(inputs, jnp.float32).reshape(B, n_qubit)
    thetas = jnp.asarray(thetas, jnp.float32).reshape(B, n_qubit * n_layer)

    # Parameter prep (glue): RY(2x) -> half-angle x ; RY(t) -> half-angle t/2.
    cin, sin_ = jnp.cos(inputs), jnp.sin(inputs)
    cth, sth = jnp.cos(0.5 * thetas), jnp.sin(0.5 * thetas)

    # Batch tiling: fat row-blocks fill MXU rows and amortize per-step overhead.
    block_b = min(256, _round_up(B, 8))
    padded_b = _round_up(B, block_b)
    if padded_b != B:
        pad = ((0, padded_b - B), (0, 0))
        cin, sin_, cth, sth = (jnp.pad(a, pad) for a in (cin, sin_, cth, sth))

    pflip = jnp.asarray(_xor_flip_matrices(n_qubit))     # (nq, dim, dim), 0/1
    pchain = jnp.asarray(_cx_chain_matrix(n_qubit))      # (dim, dim), 0/1

    kernel = _make_qlayer_kernel(n_qubit, n_layer)
    row_spec = lambda cols: pl.BlockSpec((block_b, cols), lambda i: (i, 0))
    out = pl.pallas_call(
        kernel,
        out_shape=jax.ShapeDtypeStruct((padded_b, 1), jnp.float32),
        grid=(padded_b // block_b,),
        in_specs=[
            row_spec(n_qubit), row_spec(n_qubit),
            row_spec(n_qubit * n_layer), row_spec(n_qubit * n_layer),
            pl.BlockSpec((n_qubit, dim, dim), lambda i: (0, 0, 0)),
            pl.BlockSpec((dim, dim), lambda i: (0, 0)),
        ],
        out_specs=pl.BlockSpec((block_b, 1), lambda i: (i, 0)),
        compiler_params=pltpu.CompilerParams(
            dimension_semantics=("parallel",)),
    )(cin, sin_, cth, sth, pflip, pchain)
    return out[:B]


def qlayer_forward(input_angles, theta, n_qubit=4, n_layer=2):
    """Qlayer.forward(input, alfa) -> (1, 1) float32, exact P(|0...0>)."""
    # TODO(synk): the PyTorch module estimates the probability from 1024 shots
    # on AerSimulator; here we return the exact (infinite-shot) probability.
    inp = jnp.asarray(input_angles, jnp.float32).reshape(1, n_qubit)
    th = jnp.asarray(theta, jnp.float32).reshape(1, n_qubit * n_layer)
    return qlayer_forward_batched(inp, th, n_qubit=n_qubit, n_layer=n_layer)


def _reference_prob0(inp, theta, n_qubit, n_layer):
    """Independent dense-unitary (kron-based) statevector reference."""
    dim = 2 ** n_qubit

    def ry(t):
        c, s = np.cos(t / 2.0), np.sin(t / 2.0)
        return np.array([[c, -s], [s, c]], np.float64)

    def kron_layer(mats):
        u = np.array([[1.0]])
        for q in range(n_qubit):
            u = np.kron(mats[q], u)  # qubit q <-> bit q of the basis index
        return u

    def cx_mat(ctrl, tgt):
        u = np.zeros((dim, dim))
        for i in range(dim):
            j = i ^ (1 << tgt) if (i >> ctrl) & 1 else i
            u[j, i] = 1.0
        return u

    state = np.zeros(dim, np.float64)
    state[0] = 1.0
    state = kron_layer([ry(2.0 * inp[q]) for q in range(n_qubit)]) @ state
    for l in range(n_layer):
        state = kron_layer(
            [ry(theta[l * n_qubit + q]) for q in range(n_qubit)]) @ state
        for q in range(n_qubit - 1):
            state = cx_mat(q, q + 1) @ state
    return float(state[0] ** 2)


if __name__ == "__main__":
    n_qubit, n_layer = 4, 2  # nq = 4 as in the reference module

    key = jax.random.PRNGKey(0)
    k1, k2 = jax.random.split(key)
    x = jax.random.uniform(k1, (n_qubit,), jnp.float32, 0.0, float(np.pi))
    alfa = jax.random.uniform(k2, (n_qubit * n_layer,), jnp.float32,
                              0.0, 2.0 * float(np.pi))

    # --- single forward (module semantics: (1, 1)) ---
    out = qlayer_forward(x, alfa, n_qubit=n_qubit, n_layer=n_layer)
    out = jax.block_until_ready(out)
    assert out.shape == (1, 1) and out.dtype == jnp.float32
    ref = _reference_prob0(np.asarray(x, np.float64),
                           np.asarray(alfa, np.float64), n_qubit, n_layer)
    np.testing.assert_allclose(float(out[0, 0]), ref, rtol=1e-4, atol=1e-5)

    # --- batched forward: the parameter-shift evaluation set the NN==0
    #     backward needs (base + +-pi/2 shifts for each theta), one kernel call.
    P = n_qubit * n_layer
    shifts = np.zeros((2 * P + 1, P), np.float32)
    for kk in range(P):
        shifts[2 * kk, kk] = +np.pi / 2.0
        shifts[2 * kk + 1, kk] = -np.pi / 2.0
    thetas_b = jnp.asarray(alfa)[None, :] + jnp.asarray(shifts)
    inputs_b = jnp.broadcast_to(jnp.asarray(x)[None, :], (2 * P + 1, n_qubit))

    out_b = qlayer_forward_batched(inputs_b, thetas_b,
                                   n_qubit=n_qubit, n_layer=n_layer)
    out_b = jax.block_until_ready(out_b)
    assert out_b.shape == (2 * P + 1, 1) and out_b.dtype == jnp.float32
    for b in range(2 * P + 1):
        ref_b = _reference_prob0(np.asarray(x, np.float64),
                                 np.asarray(thetas_b[b], np.float64),
                                 n_qubit, n_layer)
        np.testing.assert_allclose(float(out_b[b, 0]), ref_b,
                                   rtol=1e-4, atol=1e-5)

    print("KERNEL_OK")
</pallas_src>

<mosaic_0001>
module attributes {stable_mosaic.version = 11 : i64} {
  func.func @kernel(%arg0: i32, %arg1: memref<8x4xf32, #tpu.memory_space<vmem>>, %arg2: memref<8x4xf32, #tpu.memory_space<vmem>>, %arg3: memref<8x8xf32, #tpu.memory_space<vmem>>, %arg4: memref<8x8xf32, #tpu.memory_space<vmem>>, %arg5: memref<4x16x16xf32, #tpu.memory_space<vmem>>, %arg6: memref<16x16xf32, #tpu.memory_space<vmem>>, %arg7: memref<8x1xf32, #tpu.memory_space<vmem>>) attributes {dimension_semantics = [#tpu.dimension_semantics<parallel>], iteration_bounds = array<i64: 1>, scalar_prefetch = 0 : i64, scratch_operands = 0 : i64, tpu.core_type = #tpu.core_type<tc>, window_params = [{transform_indices = @transform_0, window_bounds = array<i64: 8, 4>}, {transform_indices = @transform_1, window_bounds = array<i64: 8, 4>}, {transform_indices = @transform_2, window_bounds = array<i64: 8, 8>}, {transform_indices = @transform_3, window_bounds = array<i64: 8, 8>}, {pipeline_mode = #tpu.pipeline_mode<synchronous>, transform_indices = @transform_4, window_bounds = array<i64: 4, 16, 16>}, {pipeline_mode = #tpu.pipeline_mode<synchronous>, transform_indices = @transform_5, window_bounds = array<i64: 16, 16>}, {transform_indices = @transform_6, window_bounds = array<i64: 8, 1>}]} {
    %0 = tpu.iota {dimensions = array<i32: 1>} : vector<1x16xi32>
    %c0_i32 = arith.constant 0 : i32
    %1 = vector.broadcast %c0_i32 : i32 to vector<1x16xi32>
    %2 = arith.shrsi %0, %1 : vector<1x16xi32>
    %c1_i32 = arith.constant 1 : i32
    %3 = vector.broadcast %c1_i32 : i32 to vector<1x16xi32>
    %4 = arith.andi %2, %3 : vector<1x16xi32>
    %5 = arith.sitofp %4 : vector<1x16xi32> to vector<1x16xf32>
    %c1_i32_0 = arith.constant 1 : i32
    %6 = vector.broadcast %c1_i32_0 : i32 to vector<1x16xi32>
    %7 = arith.shrsi %0, %6 : vector<1x16xi32>
    %c1_i32_1 = arith.constant 1 : i32
    %8 = vector.broadcast %c1_i32_1 : i32 to vector<1x16xi32>
    %9 = arith.andi %7, %8 : vector<1x16xi32>
    %10 = arith.sitofp %9 : vector<1x16xi32> to vector<1x16xf32>
    %c2_i32 = arith.constant 2 : i32
    %11 = vector.broadcast %c2_i32 : i32 to vector<1x16xi32>
    %12 = arith.shrsi %0, %11 : vector<1x16xi32>
    %c1_i32_2 = arith.constant 1 : i32
    %13 = vector.broadcast %c1_i32_2 : i32 to vector<1x16xi32>
    %14 = arith.andi %12, %13 : vector<1x16xi32>
    %15 = arith.sitofp %14 : vector<1x16xi32> to vector<1x16xf32>
    %c3_i32 = arith.constant 3 : i32
    %16 = vector.broadcast %c3_i32 : i32 to vector<1x16xi32>
    %17 = arith.shrsi %0, %16 : vector<1x16xi32>
    %c1_i32_3 = arith.constant 1 : i32
    %18 = vector.broadcast %c1_i32_3 : i32 to vector<1x16xi32>
    %19 = arith.andi %17, %18 : vector<1x16xi32>
    %20 = arith.sitofp %19 : vector<1x16xi32> to vector<1x16xf32>
    %cst = arith.constant 1.000000e+00 : f32
    %21 = vector.broadcast %cst : f32 to vector<1x16xf32>
    %22 = arith.subf %21, %5 : vector<1x16xf32>
    %cst_4 = arith.constant 1.000000e+00 : f32
    %23 = vector.broadcast %cst_4 : f32 to vector<1x16xf32>
    %24 = arith.subf %23, %10 : vector<1x16xf32>
    %cst_5 = arith.constant 1.000000e+00 : f32
    %25 = vector.broadcast %cst_5 : f32 to vector<1x16xf32>
    %26 = arith.subf %25, %15 : vector<1x16xf32>
    %cst_6 = arith.constant 1.000000e+00 : f32
    %27 = vector.broadcast %cst_6 : f32 to vector<1x16xf32>
    %28 = arith.subf %27, %20 : vector<1x16xf32>
    %29 = arith.subf %5, %22 : vector<1x16xf32>
    %30 = arith.subf %10, %24 : vector<1x16xf32>
    %31 = arith.subf %15, %26 : vector<1x16xf32>
    %32 = arith.subf %20, %28 : vector<1x16xf32>
    %c0 = arith.constant 0 : index
    %c0_7 = arith.constant 0 : index
    %33 = vector.load %arg1[%c0, %c0_7] : memref<8x4xf32, #tpu.memory_space<vmem>>, vector<8x4xf32>
    %c0_8 = arith.constant 0 : index
    %c0_9 = arith.constant 0 : index
    %34 = vector.load %arg2[%c0_8, %c0_9] : memref<8x4xf32, #tpu.memory_space<vmem>>, vector<8x4xf32>
    %c0_10 = arith.constant 0 : index
    %c0_11 = arith.constant 0 : index
    %35 = vector.load %arg3[%c0_10, %c0_11] : memref<8x8xf32, #tpu.memory_space<vmem>>, vector<8x8xf32>
    %c0_12 = arith.constant 0 : index
    %c0_13 = arith.constant 0 : index
    %36 = vector.load %arg4[%c0_12, %c0_13] : memref<8x8xf32, #tpu.memory_space<vmem>>, vector<8x8xf32>
    %37 = vector.extract_strided_slice %33 {offsets = [0, 0], sizes = [8, 1], strides = [1, 1]} : vector<8x4xf32> to vector<8x1xf32>
    %38 = vector.broadcast %37 : vector<8x1xf32> to vector<8x16xf32>
    %39 = vector.broadcast %22 : vector<1x16xf32> to vector<8x16xf32>
    %40 = arith.mulf %38, %39 : vector<8x16xf32>
    %41 = vector.extract_strided_slice %34 {offsets = [0, 0], sizes = [8, 1], strides = [1, 1]} : vector<8x4xf32> to vector<8x1xf32>
    %42 = vector.broadcast %41 : vector<8x1xf32> to vector<8x16xf32>
    %43 = vector.broadcast %5 : vector<1x16xf32> to vector<8x16xf32>
    %44 = arith.mulf %42, %43 : vector<8x16xf32>
    %45 = arith.addf %40, %44 : vector<8x16xf32>
    %46 = vector.extract_strided_slice %33 {offsets = [0, 1], sizes = [8, 1], strides = [1, 1]} : vector<8x4xf32> to vector<8x1xf32>
    %47 = vector.broadcast %46 : vector<8x1xf32> to vector<8x16xf32>
    %48 = vector.broadcast %24 : vector<1x16xf32> to vector<8x16xf32>
    %49 = arith.mulf %47, %48 : vector<8x16xf32>
    %50 = vector.extract_strided_slice %34 {offsets = [0, 1], sizes = [8, 1], strides = [1, 1]} : vector<8x4xf32> to vector<8x1xf32>
    %51 = vector.broadcast %50 : vector<8x1xf32> to vector<8x16xf32>
    %52 = vector.broadcast %10 : vector<1x16xf32> to vector<8x16xf32>
    %53 = arith.mulf %51, %52 : vector<8x16xf32>
    %54 = arith.addf %49, %53 : vector<8x16xf32>
    %55 = arith.mulf %45, %54 : vector<8x16xf32>
    %56 = vector.extract_strided_slice %33 {offsets = [0, 2], sizes = [8, 1], strides = [1, 1]} : vector<8x4xf32> to vector<8x1xf32>
    %57 = vector.broadcast %56 : vector<8x1xf32> to vector<8x16xf32>
    %58 = vector.broadcast %26 : vector<1x16xf32> to vector<8x16xf32>
    %59 = arith.mulf %57, %58 : vector<8x16xf32>
    %60 = vector.extract_strided_slice %34 {offsets = [0, 2], sizes = [8, 1], strides = [1, 1]} : vector<8x4xf32> to vector<8x1xf32>
    %61 = vector.broadcast %60 : vector<8x1xf32> to vector<8x16xf32>
    %62 = vector.broadcast %15 : vector<1x16xf32> to vector<8x16xf32>
    %63 = arith.mulf %61, %62 : vector<8x16xf32>
    %64 = arith.addf %59, %63 : vector<8x16xf32>
    %65 = arith.mulf %55, %64 : vector<8x16xf32>
    %66 = vector.extract_strided_slice %33 {offsets = [0, 3], sizes = [8, 1], strides = [1, 1]} : vector<8x4xf32> to vector<8x1xf32>
    %67 = vector.broadcast %66 : vector<8x1xf32> to vector<8x16xf32>
    %68 = vector.broadcast %28 : vector<1x16xf32> to vector<8x16xf32>
    %69 = arith.mulf %67, %68 : vector<8x16xf32>
    %70 = vector.extract_strided_slice %34 {offsets = [0, 3], sizes = [8, 1], strides = [1, 1]} : vector<8x4xf32> to vector<8x1xf32>
    %71 = vector.broadcast %70 : vector<8x1xf32> to vector<8x16xf32>
    %72 = vector.broadcast %20 : vector<1x16xf32> to vector<8x16xf32>
    %73 = arith.mulf %71, %72 : vector<8x16xf32>
    %74 = arith.addf %69, %73 : vector<8x16xf32>
    %75 = arith.mulf %65, %74 : vector<8x16xf32>
    %c0_14 = arith.constant 0 : index
    %c0_15 = arith.constant 0 : index
    %c0_16 = arith.constant 0 : index
    %76 = vector.load %arg5[%c0_14, %c0_15, %c0_16] : memref<4x16x16xf32, #tpu.memory_space<vmem>>, vector<1x16x16xf32>
    %77 = vector.shape_cast %76 : vector<1x16x16xf32> to vector<16x16xf32>
    %cst_17 = arith.constant dense<0.000000e+00> : vector<8x16xf32>
    %78 = tpu.matmul %75, %77, %cst_17 {dimension_numbers = #tpu.dot_dimension_numbers<[1], [0], [0], [1], [0, 0, 1, 1], [], []>} : vector<8x16xf32>, vector<16x16xf32>, vector<8x16xf32> -> vector<8x16xf32>
    %79 = vector.extract_strided_slice %35 {offsets = [0, 0], sizes = [8, 1], strides = [1, 1]} : vector<8x8xf32> to vector<8x1xf32>
    %80 = vector.broadcast %79 : vector<8x1xf32> to vector<8x16xf32>
    %81 = arith.mulf %80, %75 : vector<8x16xf32>
    %82 = vector.extract_strided_slice %36 {offsets = [0, 0], sizes = [8, 1], strides = [1, 1]} : vector<8x8xf32> to vector<8x1xf32>
    %83 = vector.broadcast %82 : vector<8x1xf32> to vector<8x16xf32>
    %84 = arith.mulf %83, %78 : vector<8x16xf32>
    %85 = vector.broadcast %29 : vector<1x16xf32> to vector<8x16xf32>
    %86 = arith.mulf %85, %84 : vector<8x16xf32>
    %87 = arith.addf %81, %86 : vector<8x16xf32>
    %c1 = arith.constant 1 : index
    %c0_18 = arith.constant 0 : index
    %c0_19 = arith.constant 0 : index
    %88 = vector.load %arg5[%c1, %c0_18, %c0_19] : memref<4x16x16xf32, #tpu.memory_space<vmem>>, vector<1x16x16xf32>
    %89 = vector.shape_cast %88 : vector<1x16x16xf32> to vector<16x16xf32>
    %cst_20 = arith.constant dense<0.000000e+00> : vector<8x16xf32>
    %90 = tpu.matmul %87, %89, %cst_20 {dimension_numbers = #tpu.dot_dimension_numbers<[1], [0], [0], [1], [0, 0, 1, 1], [], []>} : vector<8x16xf32>, vector<16x16xf32>, vector<8x16xf32> -> vector<8x16xf32>
    %91 = vector.extract_strided_slice %35 {offsets = [0, 1], sizes = [8, 1], strides = [1, 1]} : vector<8x8xf32> to vector<8x1xf32>
    %92 = vector.broadcast %91 : vector<8x1xf32> to vector<8x16xf32>
    %93 = arith.mulf %92, %87 : vector<8x16xf32>
    %94 = vector.extract_strided_slice %36 {offsets = [0, 1], sizes = [8, 1], strides = [1, 1]} : vector<8x8xf32> to vector<8x1xf32>
    %95 = vector.broadcast %94 : vector<8x1xf32> to vector<8x16xf32>
    %96 = arith.mulf %95, %90 : vector<8x16xf32>
    %97 = vector.broadcast %30 : vector<1x16xf32> to vector<8x16xf32>
    %98 = arith.mulf %97, %96 : vector<8x16xf32>
    %99 = arith.addf %93, %98 : vector<8x16xf32>
    %c2 = arith.constant 2 : index
    %c0_21 = arith.constant 0 : index
    %c0_22 = arith.constant 0 : index
    %100 = vector.load %arg5[%c2, %c0_21, %c0_22] : memref<4x16x16xf32, #tpu.memory_space<vmem>>, vector<1x16x16xf32>
    %101 = vector.shape_cast %100 : vector<1x16x16xf32> to vector<16x16xf32>
    %cst_23 = arith.constant dense<0.000000e+00> : vector<8x16xf32>
    %102 = tpu.matmul %99, %101, %cst_23 {dimension_numbers = #tpu.dot_dimension_numbers<[1], [0], [0], [1], [0, 0, 1, 1], [], []>} : vector<8x16xf32>, vector<16x16xf32>, vector<8x16xf32> -> vector<8x16xf32>
    %103 = vector.extract_strided_slice %35 {offsets = [0, 2], sizes = [8, 1], strides = [1, 1]} : vector<8x8xf32> to vector<8x1xf32>
    %104 = vector.broadcast %103 : vector<8x1xf32> to vector<8x16xf32>
    %105 = arith.mulf %104, %99 : vector<8x16xf32>
    %106 = vector.extract_strided_slice %36 {offsets = [0, 2], sizes = [8, 1], strides = [1, 1]} : vector<8x8xf32> to vector<8x1xf32>
    %107 = vector.broadcast %106 : vector<8x1xf32> to vector<8x16xf32>
    %108 = arith.mulf %107, %102 : vector<8x16xf32>
    %109 = vector.broadcast %31 : vector<1x16xf32> to vector<8x16xf32>
    %110 = arith.mulf %109, %108 : vector<8x16xf32>
    %111 = arith.addf %105, %110 : vector<8x16xf32>
    %c3 = arith.constant 3 : index
    %c0_24 = arith.constant 0 : index
    %c0_25 = arith.constant 0 : index
    %112 = vector.load %arg5[%c3, %c0_24, %c0_25] : memref<4x16x16xf32, #tpu.memory_space<vmem>>, vector<1x16x16xf32>
    %113 = vector.shape_cast %112 : vector<1x16x16xf32> to vector<16x16xf32>
    %cst_26 = arith.constant dense<0.000000e+00> : vector<8x16xf32>
    %114 = tpu.matmul %111, %113, %cst_26 {dimension_numbers = #tpu.dot_dimension_numbers<[1], [0], [0], [1], [0, 0, 1, 1], [], []>} : vector<8x16xf32>, vector<16x16xf32>, vector<8x16xf32> -> vector<8x16xf32>
    %115 = vector.extract_strided_slice %35 {offsets = [0, 3], sizes = [8, 1], strides = [1, 1]} : vector<8x8xf32> to vector<8x1xf32>
    %116 = vector.broadcast %115 : vector<8x1xf32> to vector<8x16xf32>
    %117 = arith.mulf %116, %111 : vector<8x16xf32>
    %118 = vector.extract_strided_slice %36 {offsets = [0, 3], sizes = [8, 1], strides = [1, 1]} : vector<8x8xf32> to vector<8x1xf32>
    %119 = vector.broadcast %118 : vector<8x1xf32> to vector<8x16xf32>
    %120 = arith.mulf %119, %114 : vector<8x16xf32>
    %121 = vector.broadcast %32 : vector<1x16xf32> to vector<8x16xf32>
    %122 = arith.mulf %121, %120 : vector<8x16xf32>
    %123 = arith.addf %117, %122 : vector<8x16xf32>
    %c0_27 = arith.constant 0 : index
    %c0_28 = arith.constant 0 : index
    %124 = vector.load %arg6[%c0_27, %c0_28] : memref<16x16xf32, #tpu.memory_space<vmem>>, vector<16x16xf32>
    %cst_29 = arith.constant dense<0.000000e+00> : vector<8x16xf32>
    %125 = tpu.matmul %123, %124, %cst_29 {dimension_numbers = #tpu.dot_dimension_numbers<[1], [0], [0], [1], [0, 0, 1, 1], [], []>} : vector<8x16xf32>, vector<16x16xf32>, vector<8x16xf32> -> vector<8x16xf32>
    %126 = vector.extract_strided_slice %35 {offsets = [0, 4], sizes = [8, 1], strides = [1, 1]} : vector<8x8xf32> to vector<8x1xf32>
    %127 = vector.broadcast %126 : vector<8x1xf32> to vector<8x16xf32>
    %128 = vector.broadcast %22 : vector<1x16xf32> to vector<8x16xf32>
    %129 = arith.mulf %127, %128 : vector<8x16xf32>
    %130 = vector.extract_strided_slice %36 {offsets = [0, 4], sizes = [8, 1], strides = [1, 1]} : vector<8x8xf32> to vector<8x1xf32>
    %131 = vector.broadcast %130 : vector<8x1xf32> to vector<8x16xf32>
    %132 = vector.broadcast %5 : vector<1x16xf32> to vector<8x16xf32>
    %133 = arith.mulf %131, %132 : vector<8x16xf32>
    %134 = arith.subf %129, %133 : vector<8x16xf32>
    %135 = vector.extract_strided_slice %35 {offsets = [0, 5], sizes = [8, 1], strides = [1, 1]} : vector<8x8xf32> to vector<8x1xf32>
    %136 = vector.broadcast %135 : vector<8x1xf32> to vector<8x16xf32>
    %137 = vector.broadcast %24 : vector<1x16xf32> to vector<8x16xf32>
    %138 = arith.mulf %136, %137 : vector<8x16xf32>
    %139 = vector.extract_strided_slice %36 {offsets = [0, 5], sizes = [8, 1], strides = [1, 1]} : vector<8x8xf32> to vector<8x1xf32>
    %140 = vector.broadcast %139 : vector<8x1xf32> to vector<8x16xf32>
    %141 = vector.broadcast %10 : vector<1x16xf32> to vector<8x16xf32>
    %142 = arith.mulf %140, %141 : vector<8x16xf32>
    %143 = arith.subf %138, %142 : vector<8x16xf32>
    %144 = arith.mulf %134, %143 : vector<8x16xf32>
    %145 = vector.extract_strided_slice %35 {offsets = [0, 6], sizes = [8, 1], strides = [1, 1]} : vector<8x8xf32> to vector<8x1xf32>
    %146 = vector.broadcast %145 : vector<8x1xf32> to vector<8x16xf32>
    %147 = vector.broadcast %26 : vector<1x16xf32> to vector<8x16xf32>
    %148 = arith.mulf %146, %147 : vector<8x16xf32>
    %149 = vector.extract_strided_slice %36 {offsets = [0, 6], sizes = [8, 1], strides = [1, 1]} : vector<8x8xf32> to vector<8x1xf32>
    %150 = vector.broadcast %149 : vector<8x1xf32> to vector<8x16xf32>
    %151 = vector.broadcast %15 : vector<1x16xf32> to vector<8x16xf32>
    %152 = arith.mulf %150, %151 : vector<8x16xf32>
    %153 = arith.subf %148, %152 : vector<8x16xf32>
    %154 = arith.mulf %144, %153 : vector<8x16xf32>
    %155 = vector.extract_strided_slice %35 {offsets = [0, 7], sizes = [8, 1], strides = [1, 1]} : vector<8x8xf32> to vector<8x1xf32>
    %156 = vector.broadcast %155 : vector<8x1xf32> to vector<8x16xf32>
    %157 = vector.broadcast %28 : vector<1x16xf32> to vector<8x16xf32>
    %158 = arith.mulf %156, %157 : vector<8x16xf32>
    %159 = vector.extract_strided_slice %36 {offsets = [0, 7], sizes = [8, 1], strides = [1, 1]} : vector<8x8xf32> to vector<8x1xf32>
    %160 = vector.broadcast %159 : vector<8x1xf32> to vector<8x16xf32>
    %161 = vector.broadcast %20 : vector<1x16xf32> to vector<8x16xf32>
    %162 = arith.mulf %160, %161 : vector<8x16xf32>
    %163 = arith.subf %158, %162 : vector<8x16xf32>
    %164 = arith.mulf %154, %163 : vector<8x16xf32>
    %165 = arith.mulf %164, %125 : vector<8x16xf32>
    %cst_30 = arith.constant dense<0.000000e+00> : vector<8xf32>
    %166 = vector.multi_reduction <add>, %165, %cst_30 [1] : vector<8x16xf32> to vector<8xf32>
    %167 = vector.shape_cast %166 : vector<8xf32> to vector<8x1xf32>
    %168 = arith.mulf %167, %167 : vector<8x1xf32>
    %c0_31 = arith.constant 0 : index
    %c0_32 = arith.constant 0 : index
    %169 = vector.load %arg7[%c0_31, %c0_32] : memref<8x1xf32, #tpu.memory_space<vmem>>, vector<8x1xf32>
    tpu.vector_store %arg7[%c0_31, %c0_32], %168 {strides = array<i32>} : memref<8x1xf32, #tpu.memory_space<vmem>>, vector<8x1xf32>,
    return
  }
  func.func @transform_0(%arg0: i32) -> (i32, i32) {
    %c0_i32 = arith.constant 0 : i32
    %c0_i32_0 = arith.constant 0 : i32
    return %arg0, %c0_i32 : i32, i32
  }
  func.func @transform_1(%arg0: i32) -> (i32, i32) {
    %c0_i32 = arith.constant 0 : i32
    %c0_i32_0 = arith.constant 0 : i32
    return %arg0, %c0_i32 : i32, i32
  }
  func.func @transform_2(%arg0: i32) -> (i32, i32) {
    %c0_i32 = arith.constant 0 : i32
    %c0_i32_0 = arith.constant 0 : i32
    return %arg0, %c0_i32 : i32, i32
  }
  func.func @transform_3(%arg0: i32) -> (i32, i32) {
    %c0_i32 = arith.constant 0 : i32
    %c0_i32_0 = arith.constant 0 : i32
    return %arg0, %c0_i32 : i32, i32
  }
  func.func @transform_4(%arg0: i32) -> (i32, i32, i32) {
    %c0_i32 = arith.constant 0 : i32
    %c0_i32_0 = arith.constant 0 : i32
    %c0_i32_1 = arith.constant 0 : i32
    %c0_i32_2 = arith.constant 0 : i32
    return %c0_i32, %c0_i32_0, %c0_i32_1 : i32, i32, i32
  }
  func.func @transform_5(%arg0: i32) -> (i32, i32) {
    %c0_i32 = arith.constant 0 : i32
    %c0_i32_0 = arith.constant 0 : i32
    %c0_i32_1 = arith.constant 0 : i32
    return %c0_i32, %c0_i32_0 : i32, i32
  }
  func.func @transform_6(%arg0: i32) -> (i32, i32) {
    %c0_i32 = arith.constant 0 : i32
    %c0_i32_0 = arith.constant 0 : i32
    return %arg0, %c0_i32 : i32, i32
  }
}

</mosaic_0001>

<bundles_post_ra>
// kernel: qlayer_forward_batched.1
= control target key start
LH: loop header
LB: loop body
LE: loop exit
PB: predicated region body
PF: predicated region fallthrough
CT: control target
= control target key end

     0   :  { %11 = vsyncpa [#allocation3], 0  ;;  %s732_s21 = smov [#allocation2]   ;;  %s917_s0 = inlined_call_operand.vmem [shape: f32[8,4], index: 0, kind: input, shape index: {}]   ;;  %s918_s1 = inlined_call_operand.vmem [shape: f32[8,4], index: 1, kind: input, shape index: {}]   ;;  %s919_s2 = inlined_call_operand.vmem [shape: f32[8,8], index: 2, kind: input, shape index: {}]   ;;  %s920_s3 = inlined_call_operand.vmem [shape: f32[8,8], index: 3, kind: input, shape index: {}]   ;;  %s921_s4 = inlined_call_operand.vmem [shape: f32[4,16,16], index: 4, kind: input, shape index: {}]   ;;  %s922_s5 = inlined_call_operand.hbm [shape: f32[16,16], index: 5, kind: input, shape index: {}]   ;;  %s923_s6 = inlined_call_operand.vmem [shape: f32[8,1], index: 6, kind: output, shape index: {}]  }
   0x1   :  { %s27_s22 = sshll.u32 %s732_s21, 4  ;;  %s708_s25 = scalar_lea.hbm %s922_s5, 256  ;;  %s28_s22 = int_to_ptr.vmem [resolvable:$true] %s27_s22 }
   0x2   :  { %p709_p0 = scmp.ne.s32.totalorder %s922_s5, %s708_s25  ;;  %p712_p1 = scmp.lt.u32.totalorder %s708_s25, %s922_s5 }
   0x4   :  { %p714_p2 = pnand %p712_p1, %p709_p0 }
   0x6   :  { %717 = shalt.err (!%p714_p2)
}
   0x7   :  { %s718_s30 = scalar_lea.vmem %s28_s22, 256  ;;  %p723_p4 = scmp.lt.s32.totalorder %s28_s22, %s28_s22 }
   0x8   :  { %p719_p3 = scmp.ne.s32.totalorder %s28_s22, %s718_s30  ;;  %p724_p5 = scmp.lt.s32.totalorder %s718_s30, %s718_s30 }
   0xa   :  { %p725_p6 = por %p724_p5, %p723_p4 }
   0xc   :  { %p726_p7 = pnand %p725_p6, %p719_p3 }
   0xe   :  { %729 = shalt.err (!%p726_p7)
}
   0xf   :  { %s733_s7 = smov 128   ;;  %s734_s8 = smov 8  }
  0x10   :  { %33 = dma.hbm_to_vmem [thread:$0]  %s922_s5, 256, %s28_s22, [#allocation3], %s733_s7, %s733_s7, %s734_s8  }
  0x11   :  { %730 = dma.done.wait [#allocation3], 256  }
  0x12   :  { %731 = vsyncadd [#allocation3], 4294967040  ;;  %v735_v0 = vmov 1   ;;  %v736_v1 = vmov 0   ;;  %v58_v2 = vld [vmem:[%s917_s0] sm:$0xff]  ;;  %v737_v4 = vmov 2   ;;  %v37_v13 = vlaneseq }
  0x13   :  { %690 = vset.pattern.permute.xlu1 %v735_v0  ;;  %689 = vset.pattern.permute.xlu0 %v736_v1  ;;  %v59_v3 = vld [vmem:[%s918_s1] sm:$0xff]  ;;  %v738_v5 = vmov 3   ;;  %v112_v7 = vld [vmem:[%s921_s4 + $0x8] sm:$0xff]  ;;  %v739_v10 = vmov 0.0|0.0   ;;  %vm740_vm0 = vmmov 0   ;;  %v741_v11 = vmov 0.0  }
  0x14   :  { %76 = vperm.xlu1 %690, %v58_v2   ;;  %64 = vperm.xlu0 %689, %v58_v2   ;;  %v111_v6 = vld [vmem:[%s921_s4] sm:$0xff]  ;;  %v38_v14 = vand.u32 127, %v37_v13  ;;  %vm113_vm1 = vcmask 130048   ;;  %v600_v53 = vld [vmem:[%s921_s4 + $0x10] sm:$0xff]  ;;  %v601_v54 = vld [vmem:[%s921_s4 + $0x18] sm:$0xff]  ;;  %vm592_vm2 = vcmask 7168  }
  0x15   :  { %v661_v8 = vpack.c.bf16 %v112_v7, %v111_v6  ;;  %v808_v9 = vld [vmem:[%s920_s3] sm:$0xff]  ;;  %660 = vmatprep.subr.bf16.mxu0 %v739_v10  ;;  %663 = vmatprep.subr.bf16.mxu1 %v739_v10  ;;  %v664_v55 = vpack.c.bf16 %v601_v54, %v600_v53 }
  0x16   :  { %629 = vmatprep.mubr.msk.f32.mxu0 %vm740_vm0, %v741_v11  ;;  %v818_v12 = vld [vmem:[%s919_s2] sm:$0xff]  ;;  %636 = vmatprep.mubr.msk.f32.mxu1 %vm740_vm0, %v741_v11  ;;  %v41_v15 = vshra.s32 %v38_v14, 1  ;;  %v44_v16 = vshra.s32 %v38_v14, 2  ;;  %v39_v18 = vand.u32 1, %v38_v14  ;;  %v47_v20 = vshra.s32 %v38_v14, 3 }
  0x17   :  { %662 = vmatpush3.bf16.msra.mxu0 %v661_v8  ;;  %665 = vmatpush3.bf16.msra.mxu1 %v664_v55 }
  0x18   :  { %81 = vperm.xlu1 %690, %v59_v3   ;;  %70 = vperm.xlu0 %689, %v59_v3   ;;  %v42_v17 = vand.u32 1, %v41_v15  ;;  %v45_v19 = vand.u32 1, %v44_v16  ;;  %v832_v24 = vcvt.s32.f32 %v39_v18  ;;  %v48_v26 = vand.u32 1, %v47_v20 }
  0x19   :  { %666 = vmatprep.subr.bf16.mxu0 %v739_v10  ;;  %669 = vmatprep.subr.bf16.mxu1 %v739_v10 }
  0x1a   :  { %v830_v23 = vcvt.s32.f32 %v42_v17  ;;  %v834_v25 = vcvt.s32.f32 %v45_v19  ;;  %v840_v30 = vsub.f32 1.0, %v832_v24  ;;  %v847_v34 = vcvt.s32.f32 %v48_v26  ;;  %v607_v17 = vld [vmem:[%s921_s4 + $0x38] sm:$0xff] }
  0x1c   :  { %692 = vset.pattern.permute.xlu1 %v737_v4  ;;  %691 = vset.pattern.permute.xlu0 %v737_v4  ;;  %v837_v29 = vsub.f32 1.0, %v830_v23  ;;  %v843_v31 = vsub.f32 1.0, %v834_v25  ;;  %v854_v43 = vsub.f32 1.0, %v847_v34  ;;  %v54_v57 = vsub.f32 %v832_v24, %v840_v30 }
  0x1d   :  { %93 = vperm.xlu1 %692, %v59_v3   ;;  %88 = vperm.xlu0 %691, %v58_v2  }
  0x1e   :  { %v56_v20 = vsub.f32 %v834_v25, %v843_v31 }
  0x21   :  { %693 = vset.pattern.permute.xlu1 %v738_v5  ;;  %694 = vset.pattern.permute.xlu0 %v738_v5 }
  0x22   :  { %100 = vperm.xlu1 %693, %v58_v2   ;;  %105 = vperm.xlu0 %694, %v59_v3   ;;  %v604_v2 = vld [vmem:[%s921_s4 + $0x28] sm:$0xff] }
  0x26   :  { %695 = vset.pattern.permute.xlu1 %v736_v1  ;;  %696 = vset.pattern.permute.xlu0 %v735_v0  ;;  %v603_v1 = vld [vmem:[%s921_s4 + $0x20] sm:$0xff] }
  0x27   :  { %195 = vperm.xlu1 %695, %v808_v9   ;;  %283 = vperm.xlu0 %696, %v808_v9   ;;  %v667_v3 = vpack.c.bf16 %v604_v2, %v603_v1 }
  0x2b   :  { %189 = vperm.xlu1 %695, %v818_v12   ;;  %699 = vset.pattern.permute.xlu0 %v737_v4 }
  0x2c   :  { %366 = vperm.xlu0 %699, %v818_v12  }
  0x2f   :  { %697 = vset.pattern.permute.xlu1 %v735_v0 }
  0x30   :  { %278 = vperm.xlu1 %697, %v818_v12  }
  0x34   :  { %698 = vset.pattern.permute.xlu1 %v737_v4 }
  0x35   :  { %371 = vperm.xlu1 %698, %v808_v9  }
  0x39   :  { %700 = vset.pattern.permute.xlu1 %v738_v5  ;;  %v55_v5 = vsub.f32 %v830_v23, %v837_v29 }
  0x3a   :  { %459 = vperm.xlu1 %700, %v808_v9  }
  0x3e   :  { %454 = vperm.xlu1 %700, %v818_v12  }
  0x93   :  { %v77_v21 = vpop.permute.xlu1 %76  ;;  %v65_v22 = vpop.permute.xlu0 %64 }
  0x94   :  { %v79_v35 = vmul.f32 %v77_v21, %v837_v29  ;;  %v67_v36 = vmul.f32 %v65_v22, %v840_v30 }
  0x97   :  { %v82_v27 = vpop.permute.xlu1 %81  ;;  %v71_v28 = vpop.permute.xlu0 %70 }
  0x98   :  { %v84_v32 = vmul.f32 %v82_v27, %v830_v23  ;;  %v73_v33 = vmul.f32 %v71_v28, %v832_v24 }
  0x9a   :  { %v85_v41 = vadd.f32 %v84_v32, %v79_v35  ;;  %v74_v42 = vadd.f32 %v73_v33, %v67_v36  ;;  %v465_v33 = vld [vmem:[#allocation2] sm:$0xff]  ;;  %v466_v35 = vld [vmem:[#allocation2 + $0x8] sm:$0xff] }
  0x9b   :  { %v673_v36 = vpack.c.bf16 %v466_v35, %v465_v33 }
  0x9c   :  { %v94_v37 = vpop.permute.xlu1 %93  ;;  %v89_v38 = vpop.permute.xlu0 %88  ;;  %v86_v47 = vmul.f32 %v85_v41, %v74_v42  ;;  %v57_v42 = vsub.f32 %v847_v34, %v854_v43 }
  0x9d   :  { %v96_v39 = vmul.f32 %v94_v37, %v834_v25  ;;  %v91_v40 = vmul.f32 %v89_v38, %v843_v31  ;;  %v742_v37 = vmov 4   ;;  %v743_v38 = vmov 5  }
  0x9e   :  { %702 = vset.pattern.permute.xlu1 %v742_v37  ;;  %701 = vset.pattern.permute.xlu0 %v742_v37 }
  0x9f   :  { %v97_v44 = vadd.f32 %v96_v39, %v91_v40  ;;  %546 = vperm.xlu1 %702, %v808_v9   ;;  %541 = vperm.xlu0 %701, %v818_v12   ;;  %v744_v39 = vmov 6   ;;  %v745_v40 = vmov 7  }
  0xa1   :  { %v101_v45 = vpop.permute.xlu1 %100  ;;  %v106_v46 = vpop.permute.xlu0 %105  ;;  %v98_v50 = vmul.f32 %v97_v44, %v86_v47 }
  0xa2   :  { %v103_v48 = vmul.f32 %v101_v45, %v854_v43  ;;  %v108_v49 = vmul.f32 %v106_v46, %v847_v34 }
  0xa3   :  { %703 = vset.pattern.permute.xlu1 %v743_v38  ;;  %704 = vset.pattern.permute.xlu0 %v743_v38 }
  0xa4   :  { %v109_v51 = vadd.f32 %v108_v49, %v103_v48  ;;  %552 = vperm.xlu1 %703, %v818_v12   ;;  %557 = vperm.xlu0 %704, %v808_v9  }
  0xa6   :  { %v110_v52 = vmul.f32 %v109_v51, %v98_v50  ;;  %v196_v56 = vpop.permute.xlu1 %195  ;;  %v284_v4 = vpop.permute.xlu0 %283 }
  0xa8   :  { %630 = vmatmul.mubr.msk.f32.vlgmr.msra.gmra.mrb[0].mxu0 %vm113_vm1, %v110_v52  ;;  %705 = vset.pattern.permute.xlu1 %v744_v39 }
  0xa9   :  { %643 = vmatprep.mubr.msk.f32.mxu0 %vm740_vm0, %v741_v11  ;;  %668 = vmatpush3.bf16.msra.mxu0 %v667_v3 }
  0xaa   :  { %v190_v58 = vpop.permute.xlu1 %189  ;;  %672 = vmatprep.subr.bf16.mxu0 %v739_v10  ;;  %v606_v10 = vld [vmem:[%s921_s4 + $0x30] sm:$0xff]  ;;  %706 = vset.pattern.permute.xlu0 %v745_v40 }
  0xab   :  { %v192_v62 = vmul.f32 %v190_v58, %v110_v52  ;;  %v670_v18 = vpack.c.bf16 %v607_v17, %v606_v10  ;;  %v367_v19 = vpop.permute.xlu0 %366  ;;  %564 = vperm.xlu1 %705, %v818_v12   ;;  %576 = vperm.xlu0 %706, %v818_v12  }
  0xaf   :  { %v279_v6 = vpop.permute.xlu1 %278  ;;  %569 = vperm.xlu1 %705, %v808_v9  }
  0xb3   :  { %707 = vset.pattern.permute.xlu1 %v745_v40 }
  0xb4   :  { %v372_v21 = vpop.permute.xlu1 %371  ;;  %581 = vperm.xlu1 %707, %v808_v9  }
  0xb9   :  { %v460_v41 = vpop.permute.xlu1 %459 }
  0xbd   :  { %v455_v44 = vpop.permute.xlu1 %454 }
 0x11e   :  { %v547_v51 = vpop.permute.xlu1 %546  ;;  %v542_v52 = vpop.permute.xlu0 %541 }
 0x11f   :  { %v549_v9 = vmul.f32 %v547_v51, %v832_v24 }
 0x123   :  { %v553_v12 = vpop.permute.xlu1 %552  ;;  %v558_v54 = vpop.permute.xlu0 %557 }
 0x124   :  { %v560_v58 = vmul.f32 %v558_v54, %v830_v23 }
 0x12a   :  { %v565_v53 = vpop.permute.xlu1 %564 }
 0x12e   :  { %v570_v55 = vpop.permute.xlu1 %569 }
 0x17b   :  { %v183_v59 = vpop.f32.mrb[0].mxu0 }
 0x17c   :  { %v198_v60 = vmul.f32 %v196_v56, %v183_v59  ;;  %v631_v61 = vpop.f32.mrb[1].mxu0  ;;  %v555_v56 = vmul.f32 %v553_v12, %v837_v29  ;;  %v567_v59 = vmul.f32 %v565_v53, %v843_v31 }
 0x17d   :  { %v572_v61 = vmul.f32 %v570_v55, %v834_v25 }
 0x17e   :  { %v199_v63 = vmul.f32 %v198_v60, %v54_v57  ;;  %v544_v57 = vmul.f32 %v542_v52, %v840_v30 }
 0x17f   :  { %v573_v1 = vsub.f32 %v567_v59, %v572_v61 }
 0x180   :  { %v200_v0 = vadd.f32 %v199_v63, %v192_v62  ;;  %v550_v60 = vsub.f32 %v544_v57, %v549_v9  ;;  %v561_v62 = vsub.f32 %v555_v56, %v560_v58  ;;  %v582_v63 = vpop.permute.xlu1 %581 }
 0x181   :  { %v584_v3 = vmul.f32 %v582_v63, %v847_v34 }
 0x182   :  { %637 = vmatmul.mubr.msk.f32.vlgmr.msra.gmra.mrb[0].mxu1 %vm113_vm1, %v200_v0  ;;  %v281_v14 = vmul.f32 %v279_v6, %v200_v0  ;;  %v577_v0 = vpop.permute.xlu0 %576  ;;  %v562_v2 = vmul.f32 %v561_v62, %v550_v60 }
 0x183   :  { %650 = vmatprep.mubr.msk.f32.mxu1 %vm740_vm0, %v741_v11  ;;  %671 = vmatpush3.bf16.msra.mxu1 %v670_v18  ;;  %v579_v24 = vmul.f32 %v577_v0, %v854_v43 }
 0x184   :  { %v574_v29 = vmul.f32 %v573_v1, %v562_v2 }
 0x255   :  { %v273_v7 = vpop.f32.mrb[0].mxu1 }
 0x256   :  { %v286_v8 = vmul.f32 %v284_v4, %v273_v7  ;;  %v638_v13 = vpop.f32.mrb[1].mxu1  ;;  %v585_v4 = vsub.f32 %v579_v24, %v584_v3 }
 0x258   :  { %v287_v15 = vmul.f32 %v286_v8, %v55_v5  ;;  %v586_v5 = vmul.f32 %v585_v4, %v574_v29 }
 0x25a   :  { %v288_v16 = vadd.f32 %v287_v15, %v281_v14 }
 0x25c   :  { %644 = vmatmul.mubr.msk.f32.vlgmr.msra.gmra.mrb[2].mxu0 %vm113_vm1, %v288_v16  ;;  %v369_v28 = vmul.f32 %v367_v19, %v288_v16 }
 0x25d   :  { %657 = vmatprep.mubr.msk.f32.mxu0 %vm740_vm0, %v741_v11  ;;  %674 = vmatpush3.bf16.msra.mxu0 %v673_v36 }
 0x32f   :  { %v361_v22 = vpop.f32.mrb[2].mxu0 }
 0x330   :  { %v374_v26 = vmul.f32 %v372_v21, %v361_v22  ;;  %v645_v27 = vpop.f32.mrb[3].mxu0 }
 0x332   :  { %v375_v11 = vmul.f32 %v374_v26, %v56_v20 }
 0x334   :  { %v376_v32 = vadd.f32 %v375_v11, %v369_v28 }
 0x336   :  { %651 = vmatmul.mubr.msk.f32.vlgmr.msra.gmra.mrb[2].mxu1 %vm113_vm1, %v376_v32  ;;  %v457_v48 = vmul.f32 %v455_v44, %v376_v32 }
 0x409   :  { %v449_v45 = vpop.f32.mrb[2].mxu1 }
 0x40a   :  { %v462_v46 = vmul.f32 %v460_v41, %v449_v45  ;;  %v652_v47 = vpop.f32.mrb[3].mxu1 }
 0x40c   :  { %v463_v49 = vmul.f32 %v462_v46, %v57_v42 }
 0x40e   :  { %v464_v50 = vadd.f32 %v463_v49, %v457_v48 }
 0x410   :  { %658 = vmatmul.mubr.msk.f32.vlgmr.msra.gmra.mrb[4].mxu0 %vm113_vm1, %v464_v50 }
 0x4e3   :  { %v536_v30 = vpop.f32.mrb[4].mxu0 }
 0x4e4   :  { %v587_v6 = vmul.f32 %v586_v5, %v536_v30  ;;  %v659_v23 = vpop.f32.mrb[5].mxu0 }
 0x4e6   :  { %v588_v31 = vsel %vm113_vm1, %v587_v6, 0.0 }
 0x4e7   :  { %589 = vadd.xlane.f32.xlu1 %v588_v31 }
 0x574   :  { %v590_v25 = vpop.xlane.xlu1 %589 }
 0x575   :  { %v591_v7 = vmul.f32 %v590_v25, %v590_v25 }
 0x577   :  { %593 = vst.msk [vmem:[%s923_s6] sm:$0xff] %vm592_vm2, %v591_v7 }
 0x578   :  { %598 = vsyncpa [#allocation3], 1 }

</bundles_post_ra>
